<compile_context>
chip_gen: v7x
topology: tpu7x:2x2x1
jax: 0.10.0
libtpu: 0.0.40
codegen_flags: <defaults>
</compile_context>

<pallas_src>
import functools

import jax
import jax.numpy as jnp
from jax import lax
from jax.experimental import pallas as pl
from jax.experimental.pallas import tpu as pltpu


def channel_gate_kernel(x_ref, city_ref, w1p_ref, w1c_ref, b1_ref,
                        w2_ref, b2_ref, out_ref, *, hw_true):
    # x_ref:   (1, C, HW_pad)   current batch slab
    # city_ref:(B, Fc)          fully resident (tiny); row selected by program_id
    # w1p_ref: (C, Dh)  w1c_ref: (Fc, Dh)  b1_ref: (1, Dh)
    # w2_ref:  (Dh, C)  b2_ref:  (1, C)
    b = pl.program_id(0)

    x = x_ref[...]                                   # (1, C, HW_pad) f32
    hw_pad = x.shape[-1]

    # ---- global avg / max pooling over the spatial (lane) axis ----
    # Padding (if any) is zeros: sum is unaffected, divide by the true HW.
    avg_pool = jnp.sum(x, axis=-1) / float(hw_true)  # (1, C)
    if hw_pad == hw_true:
        max_pool = jnp.max(x, axis=-1)               # (1, C)
    else:
        lane = lax.broadcasted_iota(jnp.int32, x.shape, 2)
        x_masked = jnp.where(lane < hw_true, x, -jnp.inf)
        max_pool = jnp.max(x_masked, axis=-1)        # (1, C)

    # ---- fused two-branch MLP (Linear -> ReLU -> Linear) ----
    # Linear(concat(pool, city)) == pool @ W1_pool + city @ W1_city + b1
    city = city_ref[pl.ds(b, 1), :]                  # (1, Fc)
    city_h = jnp.dot(city, w1c_ref[...],
                     preferred_element_type=jnp.float32)        # (1, Dh), shared

    pooled = jnp.concatenate([avg_pool, max_pool], axis=0)      # (2, C)
    h = jnp.dot(pooled, w1p_ref[...],
                preferred_element_type=jnp.float32)             # (2, Dh)
    h = jnp.maximum(h + city_h + b1_ref[...], 0.0)
    att = jnp.dot(h, w2_ref[...],
                  preferred_element_type=jnp.float32) + b2_ref[...]  # (2, C)

    channel_att_sum = att[0:1, :] + att[1:2, :]                 # (1, C)
    scale = jax.nn.sigmoid(channel_att_sum)                     # (1, C)

    # ---- apply gate (broadcast hoisted once per block) ----
    out_ref[...] = (x * scale[:, :, None]).astype(out_ref.dtype)


def channel_gate(x, city_feature, w1, b1, w2, b2):
    """x: (B, C, H, W) f32, city_feature: (B, Fc) f32.

    w1: (C + Fc, hidden)  [Linear stored as (in, out)]
    b1: (hidden,)
    w2: (hidden, gate_channels=C)
    b2: (C,)
    Returns x * sigmoid(mlp(cat(avg,city)) + mlp(cat(max,city))), NCHW shape.
    """
    B, C, H, W = x.shape
    Fc = city_feature.shape[1]
    Dh = w1.shape[1]

    HW = H * W
    HW_pad = int(pl.cdiv(HW, 128)) * 128                     # lane-dense store

    x_flat = x.reshape(B, C, HW)
    if HW_pad != HW:
        x_flat = jnp.pad(x_flat, ((0, 0), (0, 0), (0, HW_pad - HW)))

    w1_pool = w1[:C, :]                                      # (C, Dh)
    w1_city = w1[C:, :]                                      # (Fc, Dh)
    b1_2d = b1.reshape(1, Dh)
    b2_2d = b2.reshape(1, C)

    # Per-step VMEM working set: x block + out block, double-buffered, + params.
    elt = jnp.dtype(x.dtype).itemsize
    block_bytes = C * HW_pad * elt
    param_bytes = 4 * (w1.size + b1.size + w2.size + b2.size + city_feature.size)
    vmem_limit = int(min(100 * 1024 * 1024,
                         max(32 * 1024 * 1024, 4 * block_bytes + param_bytes + (4 << 20))))

    kernel = functools.partial(channel_gate_kernel, hw_true=HW)

    out_flat = pl.pallas_call(
        kernel,
        out_shape=jax.ShapeDtypeStruct((B, C, HW_pad), x.dtype),
        grid=(B,),
        in_specs=[
            pl.BlockSpec((1, C, HW_pad), lambda b: (b, 0, 0)),   # x slab for batch b
            pl.BlockSpec((B, Fc), lambda b: (0, 0)),             # city (resident)
            pl.BlockSpec((C, Dh), lambda b: (0, 0)),             # w1 pooled part
            pl.BlockSpec((Fc, Dh), lambda b: (0, 0)),            # w1 city part
            pl.BlockSpec((1, Dh), lambda b: (0, 0)),             # b1
            pl.BlockSpec((Dh, C), lambda b: (0, 0)),             # w2
            pl.BlockSpec((1, C), lambda b: (0, 0)),              # b2
        ],
        out_specs=pl.BlockSpec((1, C, HW_pad), lambda b: (b, 0, 0)),
        compiler_params=pltpu.CompilerParams(
            dimension_semantics=("parallel",),
            vmem_limit_bytes=vmem_limit,
        ),
    )(x_flat, city_feature, w1_pool, w1_city, b1_2d, w2, b2_2d)

    if HW_pad != HW:
        out_flat = out_flat[:, :, :HW]
    return out_flat.reshape(B, C, H, W)


def _reference(x, city_feature, w1, b1, w2, b2):
    avg = jnp.mean(x, axis=(2, 3))
    mx = jnp.max(x, axis=(2, 3))

    def mlp(p):
        feats = jnp.concatenate([p, city_feature], axis=1)
        h = jnp.maximum(feats @ w1 + b1, 0.0)
        return h @ w2 + b2

    att = mlp(avg) + mlp(mx)
    scale = jax.nn.sigmoid(att)[:, :, None, None]
    return x * scale


if __name__ == "__main__":
    # Shapes consistent with the module: gate_channels == C (attention broadcast
    # over channels), input_gate_channels = C + F_city, hidden = C // reduction.
    B, C, H, W = 2, 32, 16, 16
    Fc = 16
    reduction_ratio = 16
    gate_channels = C
    input_gate_channels = C + Fc
    hidden = gate_channels // reduction_ratio  # = 2

    key = jax.random.PRNGKey(0)
    kx, kc, kw1, kb1, kw2, kb2 = jax.random.split(key, 6)

    x = jax.random.normal(kx, (B, C, H, W), dtype=jnp.float32)
    city_feature = jax.random.normal(kc, (B, Fc), dtype=jnp.float32)

    # Deterministic synthetic parameters (Linear stored as (in, out)).
    w1 = 0.1 * jax.random.normal(kw1, (input_gate_channels, hidden), dtype=jnp.float32)
    b1 = 0.1 * jax.random.normal(kb1, (hidden,), dtype=jnp.float32)
    w2 = 0.1 * jax.random.normal(kw2, (hidden, gate_channels), dtype=jnp.float32)
    b2 = 0.1 * jax.random.normal(kb2, (gate_channels,), dtype=jnp.float32)

    out = channel_gate(x, city_feature, w1, b1, w2, b2)
    out = jax.block_until_ready(out)

    ref = _reference(x, city_feature, w1, b1, w2, b2)
    assert out.shape == x.shape
    assert jnp.allclose(out, ref, atol=1e-5, rtol=1e-5)

    print("KERNEL_OK")
</pallas_src>

<mosaic_0001>
module attributes {stable_mosaic.version = 11 : i64} {
  func.func @channel_gate_kernel(%arg0: i32, %arg1: memref<1x32x256xf32, #tpu.memory_space<vmem>>, %arg2: memref<2x16xf32, #tpu.memory_space<vmem>>, %arg3: memref<32x2xf32, #tpu.memory_space<vmem>>, %arg4: memref<16x2xf32, #tpu.memory_space<vmem>>, %arg5: memref<1x2xf32, #tpu.memory_space<vmem>>, %arg6: memref<2x32xf32, #tpu.memory_space<vmem>>, %arg7: memref<1x32xf32, #tpu.memory_space<vmem>>, %arg8: memref<1x32x256xf32, #tpu.memory_space<vmem>>) attributes {dimension_semantics = [#tpu.dimension_semantics<parallel>], iteration_bounds = array<i64: 2>, scalar_prefetch = 0 : i64, scratch_operands = 0 : i64, tpu.core_type = #tpu.core_type<tc>, window_params = [{transform_indices = @transform_0, window_bounds = array<i64: 1, 32, 256>}, {pipeline_mode = #tpu.pipeline_mode<synchronous>, transform_indices = @transform_1, window_bounds = array<i64: 2, 16>}, {pipeline_mode = #tpu.pipeline_mode<synchronous>, transform_indices = @transform_2, window_bounds = array<i64: 32, 2>}, {pipeline_mode = #tpu.pipeline_mode<synchronous>, transform_indices = @transform_3, window_bounds = array<i64: 16, 2>}, {pipeline_mode = #tpu.pipeline_mode<synchronous>, transform_indices = @transform_4, window_bounds = array<i64: 1, 2>}, {pipeline_mode = #tpu.pipeline_mode<synchronous>, transform_indices = @transform_5, window_bounds = array<i64: 2, 32>}, {pipeline_mode = #tpu.pipeline_mode<synchronous>, transform_indices = @transform_6, window_bounds = array<i64: 1, 32>}, {transform_indices = @transform_7, window_bounds = array<i64: 1, 32, 256>}]} {
    %c0 = arith.constant 0 : index
    %c0_0 = arith.constant 0 : index
    %c0_1 = arith.constant 0 : index
    %0 = vector.load %arg1[%c0, %c0_0, %c0_1] : memref<1x32x256xf32, #tpu.memory_space<vmem>>, vector<1x32x256xf32>
    %cst = arith.constant dense<0.000000e+00> : vector<1x32xf32>
    %1 = vector.multi_reduction <add>, %0, %cst [2] : vector<1x32x256xf32> to vector<1x32xf32>
    %cst_2 = arith.constant 2.560000e+02 : f32
    %2 = vector.broadcast %cst_2 : f32 to vector<1x32xf32>
    %3 = arith.divf %1, %2 : vector<1x32xf32>
    %cst_3 = arith.constant dense<0xFF800000> : vector<1x32xf32>
    %4 = vector.multi_reduction <maximumf>, %0, %cst_3 [2] : vector<1x32x256xf32> to vector<1x32xf32>
    %5 = arith.index_cast %arg0 : i32 to index
    %c0_4 = arith.constant 0 : index
    %6 = vector.load %arg2[%5, %c0_4] : memref<2x16xf32, #tpu.memory_space<vmem>>, vector<1x16xf32>
    %c0_5 = arith.constant 0 : index
    %c0_6 = arith.constant 0 : index
    %7 = vector.load %arg4[%c0_5, %c0_6] : memref<16x2xf32, #tpu.memory_space<vmem>>, vector<16x2xf32>
    %cst_7 = arith.constant dense<0.000000e+00> : vector<1x2xf32>
    %8 = tpu.matmul %6, %7, %cst_7 {dimension_numbers = #tpu.dot_dimension_numbers<[1], [0], [0], [1], [0, 0, 1, 1], [], []>} : vector<1x16xf32>, vector<16x2xf32>, vector<1x2xf32> -> vector<1x2xf32>
    %9 = tpu.concatenate %3, %4 in 0 : vector<1x32xf32>, vector<1x32xf32> -> vector<2x32xf32>
    %c0_8 = arith.constant 0 : index
    %c0_9 = arith.constant 0 : index
    %10 = vector.load %arg3[%c0_8, %c0_9] : memref<32x2xf32, #tpu.memory_space<vmem>>, vector<32x2xf32>
    %cst_10 = arith.constant dense<0.000000e+00> : vector<2x2xf32>
    %11 = tpu.matmul %9, %10, %cst_10 {dimension_numbers = #tpu.dot_dimension_numbers<[1], [0], [0], [1], [0, 0, 1, 1], [], []>} : vector<2x32xf32>, vector<32x2xf32>, vector<2x2xf32> -> vector<2x2xf32>
    %12 = vector.broadcast %8 : vector<1x2xf32> to vector<2x2xf32>
    %13 = arith.addf %11, %12 : vector<2x2xf32>
    %c0_11 = arith.constant 0 : index
    %c0_12 = arith.constant 0 : index
    %14 = vector.load %arg5[%c0_11, %c0_12] : memref<1x2xf32, #tpu.memory_space<vmem>>, vector<1x2xf32>
    %15 = vector.broadcast %14 : vector<1x2xf32> to vector<2x2xf32>
    %16 = arith.addf %13, %15 : vector<2x2xf32>
    %cst_13 = arith.constant 0.000000e+00 : f32
    %17 = vector.broadcast %cst_13 : f32 to vector<2x2xf32>
    %18 = arith.maximumf %16, %17 : vector<2x2xf32>
    %c0_14 = arith.constant 0 : index
    %c0_15 = arith.constant 0 : index
    %19 = vector.load %arg6[%c0_14, %c0_15] : memref<2x32xf32, #tpu.memory_space<vmem>>, vector<2x32xf32>
    %cst_16 = arith.constant dense<0.000000e+00> : vector<2x32xf32>
    %20 = tpu.matmul %18, %19, %cst_16 {dimension_numbers = #tpu.dot_dimension_numbers<[1], [0], [0], [1], [0, 0, 1, 1], [], []>} : vector<2x2xf32>, vector<2x32xf32>, vector<2x32xf32> -> vector<2x32xf32>
    %c0_17 = arith.constant 0 : index
    %c0_18 = arith.constant 0 : index
    %21 = vector.load %arg7[%c0_17, %c0_18] : memref<1x32xf32, #tpu.memory_space<vmem>>, vector<1x32xf32>
    %22 = vector.broadcast %21 : vector<1x32xf32> to vector<2x32xf32>
    %23 = arith.addf %20, %22 : vector<2x32xf32>
    %24 = vector.extract_strided_slice %23 {offsets = [0, 0], sizes = [1, 32], strides = [1, 1]} : vector<2x32xf32> to vector<1x32xf32>
    %25 = vector.extract_strided_slice %23 {offsets = [1, 0], sizes = [1, 32], strides = [1, 1]} : vector<2x32xf32> to vector<1x32xf32>
    %26 = arith.addf %24, %25 : vector<1x32xf32>
    %27 = arith.negf %26 : vector<1x32xf32>
    %28 = math.exp %27 : vector<1x32xf32>
    %cst_19 = arith.constant 1.000000e+00 : f32
    %29 = vector.broadcast %cst_19 : f32 to vector<1x32xf32>
    %30 = arith.addf %29, %28 : vector<1x32xf32>
    %31 = arith.divf %29, %30 : vector<1x32xf32>
    %32 = vector.shape_cast %31 : vector<1x32xf32> to vector<1x32x1xf32>
    %33 = vector.broadcast %32 : vector<1x32x1xf32> to vector<1x32x256xf32>
    %34 = arith.mulf %0, %33 : vector<1x32x256xf32>
    %c0_20 = arith.constant 0 : index
    %c0_21 = arith.constant 0 : index
    %c0_22 = arith.constant 0 : index
    %35 = vector.load %arg8[%c0_20, %c0_21, %c0_22] : memref<1x32x256xf32, #tpu.memory_space<vmem>>, vector<1x32x256xf32>
    tpu.vector_store %arg8[%c0_20, %c0_21, %c0_22], %34 {strides = array<i32>} : memref<1x32x256xf32, #tpu.memory_space<vmem>>, vector<1x32x256xf32>,
    return
  }
  func.func @transform_0(%arg0: i32) -> (i32, i32, i32) {
    %c0_i32 = arith.constant 0 : i32
    %c0_i32_0 = arith.constant 0 : i32
    %c0_i32_1 = arith.constant 0 : i32
    return %arg0, %c0_i32, %c0_i32_0 : i32, i32, i32
  }
  func.func @transform_1(%arg0: i32) -> (i32, i32) {
    %c0_i32 = arith.constant 0 : i32
    %c0_i32_0 = arith.constant 0 : i32
    %c0_i32_1 = arith.constant 0 : i32
    return %c0_i32, %c0_i32_0 : i32, i32
  }
  func.func @transform_2(%arg0: i32) -> (i32, i32) {
    %c0_i32 = arith.constant 0 : i32
    %c0_i32_0 = arith.constant 0 : i32
    %c0_i32_1 = arith.constant 0 : i32
    return %c0_i32, %c0_i32_0 : i32, i32
  }
  func.func @transform_3(%arg0: i32) -> (i32, i32) {
    %c0_i32 = arith.constant 0 : i32
    %c0_i32_0 = arith.constant 0 : i32
    %c0_i32_1 = arith.constant 0 : i32
    return %c0_i32, %c0_i32_0 : i32, i32
  }
  func.func @transform_4(%arg0: i32) -> (i32, i32) {
    %c0_i32 = arith.constant 0 : i32
    %c0_i32_0 = arith.constant 0 : i32
    %c0_i32_1 = arith.constant 0 : i32
    return %c0_i32, %c0_i32_0 : i32, i32
  }
  func.func @transform_5(%arg0: i32) -> (i32, i32) {
    %c0_i32 = arith.constant 0 : i32
    %c0_i32_0 = arith.constant 0 : i32
    %c0_i32_1 = arith.constant 0 : i32
    return %c0_i32, %c0_i32_0 : i32, i32
  }
  func.func @transform_6(%arg0: i32) -> (i32, i32) {
    %c0_i32 = arith.constant 0 : i32
    %c0_i32_0 = arith.constant 0 : i32
    %c0_i32_1 = arith.constant 0 : i32
    return %c0_i32, %c0_i32_0 : i32, i32
  }
  func.func @transform_7(%arg0: i32) -> (i32, i32, i32) {
    %c0_i32 = arith.constant 0 : i32
    %c0_i32_0 = arith.constant 0 : i32
    %c0_i32_1 = arith.constant 0 : i32
    return %arg0, %c0_i32, %c0_i32_0 : i32, i32, i32
  }
}

</mosaic_0001>

<bundles_post_ra>
// kernel: tpu_custom_call.1
= control target key start
LH: loop header
LB: loop body
LE: loop exit
PB: predicated region body
PF: predicated region fallthrough
CT: control target
= control target key end

     0   :  { %12 = vsyncpa [#allocation3], 0  ;;  %s1295_s0 = inlined_call_operand.hbm [shape: f32[2,32,256], index: 0, kind: input, shape index: {}]   ;;  %s1296_s1 = inlined_call_operand.vmem [shape: f32[2,16], index: 1, kind: input, shape index: {}]   ;;  %s1297_s2 = inlined_call_operand.vmem [shape: f32[32,2], index: 2, kind: input, shape index: {}]   ;;  %s1298_s3 = inlined_call_operand.vmem [shape: f32[16,2], index: 3, kind: input, shape index: {}]   ;;  %s1299_s4 = inlined_call_operand.vmem [shape: f32[1,2], index: 4, kind: input, shape index: {}]   ;;  %s1300_s5 = inlined_call_operand.vmem [shape: f32[2,32], index: 5, kind: input, shape index: {}]   ;;  %s1301_s6 = inlined_call_operand.vmem [shape: f32[1,32], index: 6, kind: input, shape index: {}]   ;;  %s1302_s7 = inlined_call_operand.hbm [shape: f32[2,32,256], index: 7, kind: output, shape index: {}]  }
   0x1   :  { %14 = vsyncpa [#allocation3 + $0x1], 0 }
   0x2   :  { %15 = vsyncpa [#allocation4], 0 }
   0x3   :  { %17 = vsyncpa [#allocation4 + $0x1], 0  ;;  %s1049_s24 = smov 0   ;;  %s1051_s25 = smov 0  }
   0x4   :  { %s1053_s26 = smov 0   ;;  %s1055_s27 = smov 0  }
   0x5 LB: > { %s1070_s28 = sadd.s32 4294967295, %s998_s27   ;;  %s780_s29 = sadd.s32 4294967294, %s998_s27   ;;  %s998_s27 = sphi %s1055_s27, %s1315_s27   ;;  %s994_s26 = sphi %s1053_s26, %s1314_s26   ;;  %s990_s25 = sphi %s1051_s25, %s1313_s25   ;;  %s986_s24 = sphi %s1049_s24, %s1312_s24  }
   0x6   : > { %s1074_s30 = sadd.s32 1, %s998_s27   ;;  %s30_s8 = sadd.s32 1, %s994_s26 }
   0x7   : > { %s27_s9 = ssub.s32 %s998_s27, %s1074_s30  ;;  %p37_p0 = scmp.ne.s32.totalorder %s994_s26, %s990_s25 }
   0x8   : > { %p28_p1 = scmp.eq.s32.totalorder %s27_s9, 0  ;;  %p38_p2 = scmp.eq.s32.totalorder %s998_s27, 0 }
   0x9   : > { %p43_p3 = scmp.ne.s32.totalorder %s990_s25, %s986_s24  ;;  %p44_p4 = scmp.eq.s32.totalorder %s1070_s28, 0 }
   0xa   : > { %s1086_s10 = scalar_select %p28_p1, %s994_s26, %s30_s8  }
   0xb   : > { %p1088_p5 = por %p38_p2, %p37_p0  ;;  %p1092_p6 = por %p44_p4, %p43_p3 }
   0xc   : > { %p193_p7 = scmp.eq.s32.totalorder %s1070_s28, 1  ;;  %p199_p8 = scmp.eq.s32.totalorder %s780_s29, 1 }
   0xd   : > { %p857_p10 = scmp.lt.s32.totalorder %s998_s27, 2  ;;  %s237_s15 = sand.u32 1, %s994_s26  }
   0xe   : > { %p1099_p11 = por %p193_p7, %p37_p0  ;;  %p1103_p12 = por %p199_p8, %p43_p3 }
   0xf   : > { %s801_s16 = sshll.u32 %s998_s27, 10  ;;  %s783_s17 = sshll.u32 %s237_s15, 6 }
  0x10   : > { %s1306_s13 = scalar_select %p1099_p11, 1, 0 }
  0x11   : > { %s1307_s14 = scalar_select %p1103_p12, 1, 0 }
  0x12   : > { %s1112_s20 = scalar_lea.hbm %s1295_s0, %s801_s16  ;;  %s241_s21 = scalar_lea.vmem [#allocation2], %s783_s17 }
  0x13   : > { %s248_s22 = sshll.u32 %s241_s21, 4  ;;  %p1116_p13 = pnand %p857_p10, %p1088_p5  ;;  %s1120_s22 = int_to_ptr.vmem [resolvable:$true] %s248_s22 }
  0x14   : > { %s1122_s29 = scalar_lea.sflag [#allocation3], %s237_s15  ;;  %s902_s8 = scalar_lea.hbm %s1112_s20, 1024 }
  0x15   : > { %p903_p0 = scmp.ne.s32.totalorder %s1112_s20, %s902_s8  ;;  %p904_p1 = pneg %p1116_p13 }
  0x16   : > { %s907_s16 = scalar_lea.hbm %s1295_s0, 2048  ;;  %p908_p4 = scmp.lt.u32.totalorder %s1112_s20, %s1295_s0 }
  0x17   : > { %p905_p2 = pnand %p904_p1, %p903_p0  ;;  %p909_p5 = scmp.lt.u32.totalorder %s907_s16, %s902_s8 }
  0x18   : > { %p911_p8 = scmp.lt.u32.totalorder %s902_s8, %s1112_s20 }
  0x19   : > { %p906_p3 = pneg %p905_p2  ;;  %p910_p7 = por %p909_p5, %p908_p4 }
  0x1b   : > { %p912_p10 = por %p911_p8, %p910_p7 }
  0x1d   : > { %p913_p9 = pnand %p912_p10, %p906_p3 }
  0x1f   : > { %916 = shalt.err (!%p913_p9)
}
  0x20   : > { %s917_s15 = scalar_lea.vmem %s1120_s22, 1024  ;;  %s1000_s19 = smov [#allocation2]  }
  0x21   : > { %p918_p0 = scmp.ne.s32.totalorder %s1120_s22, %s917_s15  ;;  %s922_s21 = sshll.u32 %s1000_s19, 4  ;;  %s923_s21 = int_to_ptr.vmem [resolvable:$false] %s922_s21 }
  0x22   : > { %s924_s9 = scalar_lea.vmem %s923_s21, 2048  ;;  %p925_p11 = scmp.lt.s32.totalorder %s1120_s22, %s923_s21 }
  0x23   : > { %p920_p2 = pnand %p918_p0, %p904_p1  ;;  %p926_p4 = scmp.lt.s32.totalorder %s924_s9, %s917_s15 }
  0x25   : > { %p921_p12 = pneg %p920_p2  ;;  %p927_p5 = por %p926_p4, %p925_p11 }
  0x27   : > { %p928_p7 = pnand %p927_p5, %p921_p12 }
  0x29   : > { %931 = shalt.err (!%p928_p7)
}
  0x2a   : > { %s1001_s8 = smov 256   ;;  %s1002_s11 = smov 16  }
  0x2b   : > { %852 = dma.hbm_to_vmem [thread:$0]  (!%p1116_p13), %s1112_s20, 1024, %s1120_s22, %s1122_s29, %s1001_s8, %s1001_s8, %s1002_s11  }
  0x2c   : > { %p786_p9 = scmp.ge.s32.totalorder %s998_s27, 1  ;;  %p256_p1 = scmp.lt.s32.totalorder %s998_s27, 3 }
  0x2e   : > { %p257_p3 = pnand %p786_p9, %p256_p1 }
  0x2f   : > { %s1153_s16 = sand.u32 (!%p257_p3), 1, %s990_s25  }
  0x30   : > { %260 = sbr.rel (%p257_p3) target bundleno = 823 (0x337), region = 48  ;;  %s787_s17 = sshll.u32 (!%p257_p3), %s1153_s16, 6 }
  0x31   : > { %s263_s18 = scalar_lea.sflag (!%p257_p3), [#allocation3], %s1153_s16  ;;  %s266_s15 = scalar_lea.vmem (!%p257_p3), [#allocation2], %s787_s17 }
  0x37   : > { %977 = dma.done.wait (%p1092_p6), %s263_s18, 1024  }
  0x38   : > { %979 = vsyncadd (%p1092_p6), %s263_s18, 4294966272  ;;  %v1163_v0 = vld [vmem:[%s266_s15 + $0x20] sm:$0xff]  ;;  %v1165_v1 = vld [vmem:[%s266_s15 + $0x28] sm:$0xff]  ;;  %v1003_v21 = vmov 0.0|0.0   ;;  %s334_s22 = scalar_lea.vmem %s1296_s1, %s1070_s28  ;;  %vm1004_vm0 = vmmov 0   ;;  %v1005_v26 = vmov 0.0   ;;  %v416_v28 = vlaneseq }
  0x39   : > { %v1167_v2 = vld [vmem:[%s266_s15] sm:$0xff]  ;;  %v311_v3 = vadd.f32 %v1165_v1, %v1163_v0  ;;  %v1171_v4 = vld [vmem:[%s266_s15 + $0x8] sm:$0xff]  ;;  %v1173_v5 = vld [vmem:[%s266_s15 + $0x30] sm:$0xff]  ;;  %v328_v15 = vmax.f32 %v1163_v0, %v1165_v1  ;;  %839 = vmatprep.subr.bf16.mxu1 %v1003_v21  ;;  %836 = vmatprep.subr.bf16.mxu0 %v1003_v21  ;;  %vm338_vm1 = vcmask 130048   ;;  %vm427_vm2 = vcmask 130112   ;;  %s296_s11 = scalar_lea.vmem [#allocation5], %s787_s17 }
  0x3a   : > { %v1175_v6 = vld [vmem:[%s266_s15 + $0x38] sm:$0xff]  ;;  %v305_v7 = vadd.f32 %v1171_v4, %v1167_v2  ;;  %v1179_v8 = vld [vmem:[%s266_s15 + $0x10] sm:$0xff]  ;;  %v322_v13 = vmax.f32 %v1167_v2, %v1171_v4  ;;  %v470_v16 = vld [vmem:[%s1297_s2] sm:$0xff]  ;;  %817 = vmatprep.mubr.msk.f32.mxu0 %vm1004_vm0, %v1005_v26  ;;  %828 = vmatprep.mubr.msk.f32.mxu1 %vm1004_vm0, %v1005_v26  ;;  %v417_v29 = vand.u32 127, %v416_v28  ;;  %v1217_v32 = vshrl.u32 %v416_v28, 7  ;;  %s706_s18 = sshll.u32 %s296_s11, 4  ;;  %s1244_s18 = int_to_ptr.vmem [resolvable:$true] %s706_s18 }
  0x3b   : > { %v1181_v9 = vld [vmem:[%s266_s15 + $0x18] sm:$0xff]  ;;  %312 = vadd.xlane.f32.xlu1 %v311_v3  ;;  %v314_v10 = vadd.f32 %v1175_v6, %v1173_v5  ;;  %v331_v14 = vmax.f32 %v1173_v5, %v1175_v6  ;;  %v471_v17 = vld [vmem:[%s1297_s2 + $0x8] sm:$0xff]  ;;  %v336_v19 = vld [vmem:[%s1298_s3] sm:$0xff]  ;;  %vm434_vm3 = vcmask 195712   ;;  %vm441_vm4 = vcmask 261312   ;;  %s802_s15 = sshll.u32 %s1070_s28, 10 }
  0x3c   : > { %306 = vadd.xlane.f32.xlu0 %v305_v7  ;;  %v308_v11 = vadd.f32 %v1181_v9, %v1179_v8  ;;  %v325_v12 = vmax.f32 %v1179_v8, %v1181_v9  ;;  %v840_v18 = vpack.c.bf16 %v471_v17, %v470_v16  ;;  %v337_v20 = vld [vmem:[%s1298_s3 + $0x8] sm:$0xff]  ;;  %v472_v23 = vld [vmem:[%s1297_s2 + $0x10] sm:$0xff]  ;;  %v473_v24 = vld [vmem:[%s1297_s2 + $0x18] sm:$0xff]  ;;  %v422_v31 = vadd.s32 4294967288, %v417_v29  ;;  %s1249_s20 = scalar_lea.hbm %s1302_s7, %s802_s15  ;;  %s693_s28 = scalar_lea.sflag [#allocation4], %s1153_s16 }
  0x3d   : > { %v837_v22 = vpack.c.bf16 %v337_v20, %v336_v19  ;;  %v843_v25 = vpack.c.bf16 %v473_v24, %v472_v23  ;;  %v335_v27 = vld [vmem:[%s334_s22] sm:$0x1]  ;;  %v429_v34 = vadd.s32 4294967280, %v417_v29  ;;  %v420_v37 = vsub.s32 %v417_v29, %v1217_v32  ;;  %s932_s22 = scalar_lea.vmem %s1244_s18, 1024  ;;  %p1309_p11 = scmp.ne.s32.totalorder %s1306_s13, 0 }
  0x3e   : > { %841 = vmatpush3.bf16.msra.mxu1 %v840_v18  ;;  %v425_v36 = vsub.s32 %v422_v31, %v1217_v32  ;;  %v436_v39 = vadd.s32 4294967272, %v417_v29  ;;  %vm468_vm5 = vcmask 1040384   ;;  %vm478_vm6 = vcmask 261120   ;;  %v792_v20 = vld [vmem:[%s1301_s6] ss:$0 sm:$0xff]  ;;  %p933_p6 = scmp.ne.s32.totalorder %s1244_s18, %s932_s22  ;;  %s1006_s23 = smov [#allocation5]  }
  0x3f   : > { %315 = vadd.xlane.f32.xlu1 %v314_v10  ;;  %838 = vmatpush3.bf16.msra.mxu0 %v837_v22  ;;  %v432_v42 = vsub.s32 %v429_v34, %v1217_v32  ;;  %vm573_vm7 = vcmask 1041408   ;;  %vm569_vm8 = vcmask 15360   ;;  %s936_s29 = sshll.u32 %s1006_s23, 4  ;;  %s937_s29 = int_to_ptr.vmem [resolvable:$false] %s936_s29 }
  0x40   : > { %309 = vadd.xlane.f32.xlu0 %v308_v11  ;;  %842 = vmatprep.subr.bf16.mxu1 %v1003_v21  ;;  %v439_v47 = vsub.s32 %v436_v39, %v1217_v32  ;;  %v561_v11 = vld [vmem:[%s1300_s5] sm:$0x3]  ;;  %p934_p12 = pnand %p933_p6, %p1309_p11  ;;  %s938_s19 = scalar_lea.vmem %s937_s29, 2048 }
  0x41   : > { %831 = vmatprep.subr.mxu0 %v1005_v26  ;;  %p939_p8 = scmp.lt.s32.totalorder %s1244_s18, %s937_s29  ;;  %p940_p10 = scmp.lt.s32.totalorder %s938_s19, %s932_s22 }
  0x42   : > { %818 = vmatmul.mubr.msk.f32.vlgmr.msra.gmra.mrb[0].mxu0 %vm338_vm1, %v335_v27  ;;  %844 = vmatpush3.bf16.msra.mxu1 %v843_v25  ;;  %p935_p13 = pneg %p934_p12 }
  0x43   : > { %326 = vmax.xlane.f32.xlu1 %v325_v12  ;;  %833 = vmatprep.mubr.msk.f32.mxu0 %vm1004_vm0, %v1005_v26  ;;  %v476_v12 = vsub.s32 0, %v1217_v32  ;;  %p941_p0 = por %p940_p10, %p939_p8 }
  0x44   : > { %323 = vmax.xlane.f32.xlu0 %v322_v13  ;;  %832 = vmatpush3.msk.msra.mxu0 %vm573_vm7, %v561_v11 }
  0x45   : > { %p942_p2 = pnand %p941_p0, %p935_p13 }
  0x47   : > { %332 = vmax.xlane.f32.xlu1 %v331_v14 }
  0x48   : > { %329 = vmax.xlane.f32.xlu0 %v328_v15  ;;  %v791_v15 = vld [vmem:[%s1299_s4] ss:$0 sm:$0xff] }
  0xc8   : > { %v313_v30 = vpop.xlane.xlu1 %312 }
  0xc9   : > { %v307_v33 = vpop.xlane.xlu0 %306  ;;  %v320_v43 = vmul.f32 0.00390625, %v313_v30 }
  0xca   : > { %v318_v38 = vmul.f32 0.00390625, %v307_v33 }
  0xcb   : > { %v433_v53 = vrot.slane %v320_v43, %v432_v42 }
  0xcc   : > { %v316_v35 = vpop.xlane.xlu1 %315  ;;  %v421_v46 = vrot.slane %v318_v38, %v420_v37 }
  0xcd   : > { %v310_v40 = vpop.xlane.xlu0 %309  ;;  %v321_v48 = vmul.f32 0.00390625, %v316_v35 }
  0xce   : > { %v319_v41 = vmul.f32 0.00390625, %v310_v40 }
  0xcf   : > { %v440_v55 = vrot.slane %v321_v48, %v439_v47 }
  0xd0   : > { %v426_v44 = vrot.slane %v319_v41, %v425_v36  ;;  %v327_v45 = vpop.xlane.xlu1 %326 }
  0xd1   : > { %v324_v49 = vpop.xlane.xlu0 %323  ;;  %v455_v51 = vrot.slane %v327_v45, %v425_v36 }
  0xd2   : > { %v428_v50 = vsel %vm427_vm2, %v426_v44, %v421_v46  ;;  %v451_v52 = vrot.slane %v324_v49, %v420_v37 }
  0xd3   : > { %v435_v59 = vsel %vm434_vm3, %v433_v53, %v428_v50 }
  0xd4   : > { %v333_v54 = vpop.xlane.xlu1 %332  ;;  %v456_v60 = vsel %vm427_vm2, %v455_v51, %v451_v52  ;;  %v442_v63 = vsel %vm441_vm4, %v440_v55, %v435_v59 }
  0xd5   : > { %v330_v56 = vpop.xlane.xlu0 %329  ;;  %v465_v57 = vrot.slane %v333_v54, %v439_v47 }
  0xd6   : > { %v460_v58 = vrot.slane %v330_v56, %v432_v42 }
  0xd8   : > { %v461_v61 = vsel %vm434_vm3, %v460_v58, %v456_v60 }
  0xd9   : > { %v466_v62 = vsel %vm441_vm4, %v465_v57, %v461_v61 }
  0xda   : > { %v469_v3 = vsel %vm468_vm5, %v442_v63, %v466_v62 }
  0xdb   : > { %829 = vmatmul.mubr.msk.f32.vlgmr.msra.gmra.mrb[0].mxu1 %vm478_vm6, %v469_v3 }
 0x115   : > { %v408_v7 = vpop.f32.mrb[0].mxu0 }
 0x116   : > { %v819_v10 = vpop.f32.mrb[1].mxu0  ;;  %v477_v13 = vrot.slane %v408_v7, %v476_v12 }
 0x1ae   : > { %v548_v14 = vpop.f32.mrb[0].mxu1 }
 0x1af   : > { %v549_v16 = vadd.f32 %v548_v14, %v477_v13  ;;  %v830_v17 = vpop.f32.mrb[1].mxu1 }
 0x1b1   : > { %v559_v18 = vadd.f32 %v791_v15, %v549_v16 }
 0x1b3   : > { %v560_v19 = vmax.f32 %v559_v18, 0.0 }
 0x1b5   : > { %834 = vmatmul.mubr.msk.f32.vlgmr.msra.gmra.mrb[2].mxu0 %vm569_vm8, %v560_v19 }
 0x288   : > { %v643_v21 = vpop.f32.mrb[2].mxu0 }
 0x289   : > { %v644_v22 = vadd.f32 %v792_v20, %v643_v21  ;;  %v835_v23 = vpop.f32.mrb[3].mxu0 }
 0x28b   : > { %v648_v24 = vrot.slane %v644_v22, 1 }
 0x28d   : > { %v650_v25 = vadd.f32 %v648_v24, %v644_v22 }
 0x28f   : > { %v795_v26 = vmul.f32 -1.442695, %v650_v25 }
 0x291   : > { %898 = vpow2.f32 %v795_v26 }
 0x29b   : > { %v899_v27 = vpop.eup %898 }
 0x29c   : > { %v654_v28 = vadd.f32 1.0, %v899_v27 }
 0x29e   : > { %900 = vrcp.f32 %v654_v28 }
 0x2a8   : > { %v901_v29 = vpop.eup %900 }
 0x2a9   : > { %v660_v30 = vrot.slane %v901_v29, %v476_v12 }
 0x2ab   : > { %666 = vbcast.lane.b32.xlu1 %v660_v30, 264  ;;  %662 = vbcast.lane.b32.xlu0 %v660_v30, 256 }
 0x2af   : > { %670 = vbcast.lane.b32.xlu1 %v660_v30, 272 }
 0x2b3   : > { %674 = vbcast.lane.b32.xlu1 %v660_v30, 280 }
 0x31d   : > { %v667_v31 = vpop.permute.xlu1 %666  ;;  %v663_v32 = vpop.permute.xlu0 %662 }
 0x31e   : > { %v678_v33 = vmul.f32 %v667_v31, %v1179_v8  ;;  %v679_v34 = vmul.f32 %v667_v31, %v1181_v9  ;;  %v676_v35 = vmul.f32 %v663_v32, %v1167_v2  ;;  %v677_v36 = vmul.f32 %v663_v32, %v1171_v4 }
 0x320   : > { %686 = vst [vmem:[%s296_s11 + $0x10] sm:$0xff] %v678_v33  ;;  %687 = vst [vmem:[%s296_s11 + $0x18] sm:$0xff] %v679_v34 }
 0x321   : > { %684 = vst [vmem:[%s296_s11] sm:$0xff] %v676_v35  ;;  %685 = vst [vmem:[%s296_s11 + $0x8] sm:$0xff] %v677_v36  ;;  %v671_v37 = vpop.permute.xlu1 %670 }
 0x322   : > { %v680_v38 = vmul.f32 %v671_v37, %v1163_v0  ;;  %v681_v8 = vmul.f32 %v671_v37, %v1165_v1 }
 0x324   : > { %688 = vst [vmem:[%s296_s11 + $0x20] sm:$0xff] %v680_v38  ;;  %689 = vst [vmem:[%s296_s11 + $0x28] sm:$0xff] %v681_v8 }
 0x325   : > { %v675_v2 = vpop.permute.xlu1 %674 }
 0x326   : > { %v682_v4 = vmul.f32 %v675_v2, %v1173_v5  ;;  %v683_v0 = vmul.f32 %v675_v2, %v1175_v6 }
 0x328   : > { %690 = vst [vmem:[%s296_s11 + $0x30] sm:$0xff] %v682_v4  ;;  %691 = vst [vmem:[%s296_s11 + $0x38] sm:$0xff] %v683_v0 }
 0x329   : > { %945 = shalt.err (!%p942_p2)
}
 0x32a   : > { %s946_s21 = scalar_lea.hbm %s1249_s20, 1024  ;;  %s950_s11 = scalar_lea.hbm %s1302_s7, 2048 }
 0x32b   : > { %p947_p4 = scmp.ne.s32.totalorder %s1249_s20, %s946_s21  ;;  %p951_p9 = scmp.lt.u32.totalorder %s1249_s20, %s1302_s7 }
 0x32c   : > { %p952_p1 = scmp.lt.u32.totalorder %s950_s11, %s946_s21  ;;  %p954_p6 = scmp.lt.u32.totalorder %s946_s21, %s1249_s20 }
 0x32d   : > { %p948_p5 = pnand %p947_p4, %p1309_p11 }
 0x32e   : > { %p953_p3 = por %p952_p1, %p951_p9 }
 0x32f   : > { %p949_p7 = pneg %p948_p5 }
 0x330   : > { %p955_p12 = por %p954_p6, %p953_p3 }
 0x332   : > { %p956_p13 = pnand %p955_p12, %p949_p7 }
 0x334   : > { %959 = shalt.err (!%p956_p13)
}
 0x335   : > { %s1007_s12 = smov 256   ;;  %s1008_s22 = smov 16  }
 0x336   : > { %847 = dma.vmem_to_hbm [thread:$0]  (%p1309_p11), %s1244_s18, 1024, %s1249_s20, %s693_s28, %s1007_s12, %s1007_s12, %s1008_s22  }
 0x337 PF: > { %s721_s23 = sand.u32 1, %s986_s24   ;;  %p1310_p8 = scmp.ne.s32.totalorder %s1307_s14, 0 }
 0x338   : > { %p1311_p10 = scmp.ge.s32.totalorder %s998_s27, 2  ;;  %s722_s29 = scalar_lea.sflag [#allocation4], %s721_s23 }
 0x33a   : > { %p854_p0 = pnand %p1311_p10, %p1310_p8 }
 0x33c   : > { %981 = dma.done.wait (!%p854_p0), %s722_s29, 1024  }
 0x33d   : > { %983 = vsyncadd (!%p854_p0), %s722_s29, 4294966272  ;;  %p20_p2 = scmp.ge.s32.totalorder %s1074_s30, 4   ;;  %s1312_s24 = smov %s990_s25 }
 0x33e   : > { %s1313_s25 = smov %s994_s26  ;;  %s1314_s26 = smov %s1086_s10 }
 0x33f   : > { %s1315_s27 = smov %s1074_s30  ;;  %22 = sbr.rel (!%p20_p2) target bundleno = 5 (0x5), region = 94 }
 0x346   :  { %727 = vsyncpa [#allocation3], 1 }
 0x347   :  { %729 = vsyncpa [#allocation3 + $0x1], 1 }
 0x348   :  { %730 = vsyncpa [#allocation4], 1 }
 0x349   :  { %732 = vsyncpa [#allocation4 + $0x1], 1 }

</bundles_post_ra>
